<compile_context>
chip_gen: v7x
topology: tpu7x:2x2x1
jax: 0.10.0
libtpu: 0.0.40
codegen_flags: <defaults>
</compile_context>

<pallas_src>
import functools

import jax
import jax.numpy as jnp
from jax.experimental import pallas as pl
from jax.experimental.pallas import tpu as pltpu


def _round_up(n, m):
    return ((n + m - 1) // m) * m


def _leaky_relu(v):
    # PyTorch nn.LeakyReLU default negative_slope = 0.01 (mul+max, 2 VALU ops).
    return jnp.maximum(v, 0.01 * v)


def _realnvp_kernel(x_ref, inv_mask_ref, inv_sf_ref,
                    w1_ref, b1_ref, w2_ref, b2_ref, w3_ref, b3_ref,
                    y_ref, logdet_ref, *, d, d_pad, h_pad, split_23,
                    matmul_dtype):
    x = x_ref[...].astype(jnp.float32)      # [TB, D]
    inv_mask = inv_mask_ref[...]            # [1, D]   (1 - mask)
    inv_sf = inv_sf_ref[...]                # [1, D]   (1 - mask) * scale_factor

    x2 = inv_mask * x                       # half to be transformed
    x1 = x - x2                             # == mask * x  (network input)

    # Layer 1 (scale|translate concatenated): bf16 operands, f32 accumulation.
    h = jnp.dot(x1.astype(matmul_dtype), w1_ref[...],
                preferred_element_type=jnp.float32) + b1_ref[...]
    h = _leaky_relu(h)

    if split_23:
        # Large H: contract the two halves separately (no structural zeros).
        h_s, h_t = h[:, :h_pad], h[:, h_pad:]
        g_s = _leaky_relu(
            jnp.dot(h_s.astype(matmul_dtype), w2_ref[0],
                    preferred_element_type=jnp.float32) + b2_ref[:, :h_pad])
        g_t = _leaky_relu(
            jnp.dot(h_t.astype(matmul_dtype), w2_ref[1],
                    preferred_element_type=jnp.float32) + b2_ref[:, h_pad:])
        # Final contraction stays f32: it feeds log|det J| directly.
        s_out = (jnp.dot(g_s, w3_ref[0], preferred_element_type=jnp.float32)
                 + b3_ref[:, :d_pad])[:, :d]
        t_out = (jnp.dot(g_t, w3_ref[1], preferred_element_type=jnp.float32)
                 + b3_ref[:, d_pad:])[:, :d]
    else:
        # Small H: block-diagonal fused W2 / W3 (3 matmuls total).
        h = _leaky_relu(jnp.dot(h.astype(matmul_dtype), w2_ref[...],
                                preferred_element_type=jnp.float32) + b2_ref[...])
        st = jnp.dot(h, w3_ref[...],
                     preferred_element_type=jnp.float32) + b3_ref[...]
        s_out = st[:, :d]                   # scale-net output      [TB, D]
        t_out = st[:, d_pad:d_pad + d]      # translate-net output  [TB, D]

    sx1 = s_out * inv_sf                    # (1 - mask) & scale_factor folded in
    tx1 = inv_mask * t_out

    # Coupling transform (f32 elementwise).
    y = x1 + x2 * jnp.exp(sx1) + tx1
    y_ref[...] = y.astype(y_ref.dtype)
    # log|det J| = sum_d sx1 -> one f32 per row (no redundant lane slab).
    logdet_ref[...] = jnp.sum(sx1, axis=-1, keepdims=True)


def _fuse_params(scale_params, translate_params, D, H, d_pad, split_23,
                 matmul_dtype):
    """Pack the two MLPs into fused, lane-aligned weight stacks."""
    w1s, b1s, w2s, b2s, w3s, b3s = [jnp.asarray(a, jnp.float32)
                                    for a in scale_params]
    w1t, b1t, w2t, b2t, w3t, b3t = [jnp.asarray(a, jnp.float32)
                                    for a in translate_params]
    if split_23:
        hp = _round_up(H, 128)
        W1 = (jnp.zeros((D, 2 * hp), jnp.float32)
              .at[:, :H].set(w1s).at[:, hp:hp + H].set(w1t))
        b1 = (jnp.zeros((1, 2 * hp), jnp.float32)
              .at[0, :H].set(b1s).at[0, hp:hp + H].set(b1t))
        W2 = (jnp.zeros((2, hp, hp), jnp.float32)
              .at[0, :H, :H].set(w2s).at[1, :H, :H].set(w2t))
        b2 = (jnp.zeros((1, 2 * hp), jnp.float32)
              .at[0, :H].set(b2s).at[0, hp:hp + H].set(b2t))
        W3 = (jnp.zeros((2, hp, d_pad), jnp.float32)
              .at[0, :H, :D].set(w3s).at[1, :H, :D].set(w3t))
    else:
        hp2 = _round_up(2 * H, 128)
        W1 = (jnp.zeros((D, hp2), jnp.float32)
              .at[:, :H].set(w1s).at[:, H:2 * H].set(w1t))
        b1 = (jnp.zeros((1, hp2), jnp.float32)
              .at[0, :H].set(b1s).at[0, H:2 * H].set(b1t))
        W2 = (jnp.zeros((hp2, hp2), jnp.float32)              # block-diagonal
              .at[:H, :H].set(w2s).at[H:2 * H, H:2 * H].set(w2t))
        b2 = (jnp.zeros((1, hp2), jnp.float32)
              .at[0, :H].set(b2s).at[0, H:2 * H].set(b2t))
        W3 = (jnp.zeros((hp2, 2 * d_pad), jnp.float32)        # block-diagonal
              .at[:H, :D].set(w3s).at[H:2 * H, d_pad:d_pad + D].set(w3t))
    b3 = (jnp.zeros((1, 2 * d_pad), jnp.float32)
          .at[0, :D].set(b3s).at[0, d_pad:d_pad + D].set(b3t))
    # W3 kept in f32 (final contraction feeds the log-likelihood term).
    return (W1.astype(matmul_dtype), b1, W2.astype(matmul_dtype), b2, W3, b3)


def realnvp_layer_forward(x, mask, scale_factor, scale_params, translate_params,
                          *, block_b=1024, matmul_dtype=jnp.bfloat16):
    """RealNVP coupling-layer forward.

    x: [B, D]; mask / scale_factor: [D];
    scale_params / translate_params: (w1, b1, w2, b2, w3, b3) with weights
    stored as (in_features, out_features)  (transpose of torch.nn.Linear).
    Returns (y [B, D], log_det_jacobian [B]).
    """
    B, D = x.shape
    H = scale_params[0].shape[1]
    assert translate_params[0].shape == (D, H)

    d_pad = _round_up(D, 128)
    hp = _round_up(H, 128)
    hp2 = _round_up(2 * H, 128)
    # Fuse W2/W3 block-diagonally only when padding (not structural zeros)
    # dominates; otherwise split halves cost half the MXU FLOPs / weight VMEM.
    split_23 = hp2 * hp2 > 2 * hp * hp
    h_pad = hp if split_23 else hp2

    # TODO(synk): sweep TB per generation (v5e/v6e ~1024-2048, v7x sized to the
    # ~48 MiB budget) once production shapes are known.
    TB = _round_up(min(block_b, _round_up(B, 8)), 8)
    num_tiles = pl.cdiv(B, TB)          # ragged last tile handled by Pallas

    W1, b1, W2, b2, W3, b3 = _fuse_params(scale_params, translate_params,
                                          D, H, d_pad, split_23, matmul_dtype)

    mask_f = jnp.asarray(mask, jnp.float32).reshape(1, D)
    inv_mask = 1.0 - mask_f
    inv_sf = inv_mask * jnp.asarray(scale_factor, jnp.float32).reshape(1, D)

    # VMEM budget: ~75% of physical with >=16 MiB headroom
    # (v7x: 64 MiB/TC -> 48 MiB; v5e/v6e: 128 MiB -> 96 MiB).
    try:
        cap = pltpu.get_tpu_info().vmem_capacity_bytes
        vmem_limit = max(32 << 20, min((cap * 3) // 4, cap - (16 << 20)))
    except Exception:
        vmem_limit = 48 << 20

    batch_tile = lambda i: (i, 0)
    # Grid-invariant operands: whole array, VMEM-resident, single copy.
    resident = lambda: pl.BlockSpec(memory_space=pltpu.MemorySpace.VMEM)
    # Deeper buffering on streamed x/y only pays off when the grid is long
    # (hides DMA issue latency at v7x's per-TC HBM bandwidth).
    if num_tiles >= 3:
        x_spec = pl.BlockSpec((TB, D), batch_tile, pipeline_mode=pl.Buffered(3))
        y_spec = pl.BlockSpec((TB, D), batch_tile, pipeline_mode=pl.Buffered(3))
    else:
        x_spec = pl.BlockSpec((TB, D), batch_tile)
        y_spec = pl.BlockSpec((TB, D), batch_tile)
    ld_spec = pl.BlockSpec((TB, 1), batch_tile)

    kernel = functools.partial(_realnvp_kernel, d=D, d_pad=d_pad, h_pad=h_pad,
                               split_23=split_23, matmul_dtype=matmul_dtype)

    y, logdet = pl.pallas_call(
        kernel,
        out_shape=(
            jax.ShapeDtypeStruct((B, D), x.dtype),      # y (bf16 I/O supported)
            jax.ShapeDtypeStruct((B, 1), jnp.float32),  # log|det J| per row
        ),
        grid=(num_tiles,),
        in_specs=[x_spec,
                  resident(), resident(),               # inv_mask, inv_sf
                  resident(), resident(),               # W1, b1
                  resident(), resident(),               # W2, b2
                  resident(), resident()],              # W3, b3
        out_specs=(y_spec, ld_spec),
        compiler_params=pltpu.CompilerParams(
            dimension_semantics=("parallel",),
            vmem_limit_bytes=int(vmem_limit),
        ),
    )(x, inv_mask, inv_sf, W1, b1, W2, b2, W3, b3)

    return y, logdet[:, 0]


def _init_mlp(key, layer_dim, hidden_size):
    """Deterministic init of Linear(D,H)->LeakyReLU->Linear(H,H)->LeakyReLU->Linear(H,D).
    Weights stored as (in, out)."""
    k1, k2, k3, k4, k5, k6 = jax.random.split(key, 6)
    s = 0.1
    w1 = s * jax.random.normal(k1, (layer_dim, hidden_size), jnp.float32)
    b1 = s * jax.random.normal(k2, (hidden_size,), jnp.float32)
    w2 = s * jax.random.normal(k3, (hidden_size, hidden_size), jnp.float32)
    b2 = s * jax.random.normal(k4, (hidden_size,), jnp.float32)
    w3 = s * jax.random.normal(k5, (hidden_size, layer_dim), jnp.float32)
    b3 = s * jax.random.normal(k6, (layer_dim,), jnp.float32)
    return (w1, b1, w2, b2, w3, b3)


def _reference_forward(x, mask, scale_factor, scale_params, translate_params):
    """Pure-JAX f32 reference mirroring the PyTorch forward()."""
    def mlp(v, params):
        w1, b1, w2, b2, w3, b3 = params
        h = v @ w1 + b1
        h = jnp.where(h > 0, h, 0.01 * h)
        h = h @ w2 + b2
        h = jnp.where(h > 0, h, 0.01 * h)
        return h @ w3 + b3

    x1 = mask * x
    x2 = (1.0 - mask) * x
    sx1 = (1.0 - mask) * mlp(x1, scale_params) * scale_factor
    tx1 = (1.0 - mask) * mlp(x1, translate_params)
    y = x1 + x2 * jnp.exp(sx1) + tx1
    return y, jnp.sum(sx1, axis=-1)


if __name__ == "__main__":
    B, D, H = 8, 8, 32

    key = jax.random.PRNGKey(0)
    kx, ksf, ks, kt = jax.random.split(key, 4)

    x = jax.random.normal(kx, (B, D), jnp.float32)
    # Alternating binary mask, as typical for RealNVP coupling layers.
    mask = (jnp.arange(D) % 2).astype(jnp.float32)
    scale_factor = 0.5 * jax.random.normal(ksf, (D,), jnp.float32)

    scale_params = _init_mlp(ks, D, H)
    translate_params = _init_mlp(kt, D, H)

    y, logdet = realnvp_layer_forward(x, mask, scale_factor, scale_params,
                                      translate_params)
    jax.block_until_ready((y, logdet))

    y_ref, logdet_ref = _reference_forward(x, mask, scale_factor, scale_params,
                                           translate_params)
    assert y.shape == (B, D) and logdet.shape == (B,)
    # Layer-1/2 matmuls use bf16 operands (f32 accumulation, f32 final layer).
    assert jnp.allclose(y, y_ref, atol=2e-2, rtol=2e-2), "y mismatch"
    assert jnp.allclose(logdet, logdet_ref, atol=2e-2, rtol=2e-2), "logdet mismatch"

    print("KERNEL_OK")
</pallas_src>

<mosaic_0001>
module attributes {stable_mosaic.version = 11 : i64} {
  func.func @_realnvp_kernel(%arg0: i32, %arg1: memref<8x8xf32, #tpu.memory_space<vmem>>, %arg2: memref<1x8xf32, #tpu.memory_space<vmem>>, %arg3: memref<1x8xf32, #tpu.memory_space<vmem>>, %arg4: memref<8x128xbf16, #tpu.memory_space<vmem>>, %arg5: memref<1x128xf32, #tpu.memory_space<vmem>>, %arg6: memref<128x128xbf16, #tpu.memory_space<vmem>>, %arg7: memref<1x128xf32, #tpu.memory_space<vmem>>, %arg8: memref<128x256xf32, #tpu.memory_space<vmem>>, %arg9: memref<1x256xf32, #tpu.memory_space<vmem>>, %arg10: memref<8x8xf32, #tpu.memory_space<vmem>>, %arg11: memref<8x1xf32, #tpu.memory_space<vmem>>) attributes {dimension_semantics = [#tpu.dimension_semantics<parallel>], iteration_bounds = array<i64: 1>, scalar_prefetch = 0 : i64, scratch_operands = 0 : i64, tpu.core_type = #tpu.core_type<tc>, window_params = [{transform_indices = @transform_0, window_bounds = array<i64: 8, 8>}, {pipeline_mode = #tpu.pipeline_mode<synchronous>, transform_indices = @transform_1, window_bounds = array<i64: 1, 8>}, {pipeline_mode = #tpu.pipeline_mode<synchronous>, transform_indices = @transform_2, window_bounds = array<i64: 1, 8>}, {pipeline_mode = #tpu.pipeline_mode<synchronous>, transform_indices = @transform_3, window_bounds = array<i64: 8, 128>}, {pipeline_mode = #tpu.pipeline_mode<synchronous>, transform_indices = @transform_4, window_bounds = array<i64: 1, 128>}, {pipeline_mode = #tpu.pipeline_mode<synchronous>, transform_indices = @transform_5, window_bounds = array<i64: 128, 128>}, {pipeline_mode = #tpu.pipeline_mode<synchronous>, transform_indices = @transform_6, window_bounds = array<i64: 1, 128>}, {pipeline_mode = #tpu.pipeline_mode<synchronous>, transform_indices = @transform_7, window_bounds = array<i64: 128, 256>}, {pipeline_mode = #tpu.pipeline_mode<synchronous>, transform_indices = @transform_8, window_bounds = array<i64: 1, 256>}, {transform_indices = @transform_9, window_bounds = array<i64: 8, 8>}, {transform_indices = @transform_10, window_bounds = array<i64: 8, 1>}]} {
    %c0 = arith.constant 0 : index
    %c0_0 = arith.constant 0 : index
    %0 = vector.load %arg1[%c0, %c0_0] : memref<8x8xf32, #tpu.memory_space<vmem>>, vector<8x8xf32>
    %c0_1 = arith.constant 0 : index
    %c0_2 = arith.constant 0 : index
    %1 = vector.load %arg2[%c0_1, %c0_2] : memref<1x8xf32, #tpu.memory_space<vmem>>, vector<1x8xf32>
    %c0_3 = arith.constant 0 : index
    %c0_4 = arith.constant 0 : index
    %2 = vector.load %arg3[%c0_3, %c0_4] : memref<1x8xf32, #tpu.memory_space<vmem>>, vector<1x8xf32>
    %3 = vector.broadcast %1 : vector<1x8xf32> to vector<8x8xf32>
    %4 = arith.mulf %3, %0 : vector<8x8xf32>
    %5 = arith.subf %0, %4 : vector<8x8xf32>
    %6 = arith.truncf %5 : vector<8x8xf32> to vector<8x8xbf16>
    %c0_5 = arith.constant 0 : index
    %c0_6 = arith.constant 0 : index
    %7 = vector.load %arg4[%c0_5, %c0_6] : memref<8x128xbf16, #tpu.memory_space<vmem>>, vector<8x128xbf16>
    %cst = arith.constant dense<0.000000e+00> : vector<8x128xf32>
    %8 = tpu.matmul %6, %7, %cst {dimension_numbers = #tpu.dot_dimension_numbers<[1], [0], [0], [1], [0, 0, 1, 1], [], []>} : vector<8x8xbf16>, vector<8x128xbf16>, vector<8x128xf32> -> vector<8x128xf32>
    %c0_7 = arith.constant 0 : index
    %c0_8 = arith.constant 0 : index
    %9 = vector.load %arg5[%c0_7, %c0_8] : memref<1x128xf32, #tpu.memory_space<vmem>>, vector<1x128xf32>
    %10 = vector.broadcast %9 : vector<1x128xf32> to vector<8x128xf32>
    %11 = arith.addf %8, %10 : vector<8x128xf32>
    %cst_9 = arith.constant 0.00999999977 : f32
    %12 = vector.broadcast %cst_9 : f32 to vector<8x128xf32>
    %13 = arith.mulf %12, %11 : vector<8x128xf32>
    %14 = arith.maximumf %11, %13 : vector<8x128xf32>
    %15 = arith.truncf %14 : vector<8x128xf32> to vector<8x128xbf16>
    %c0_10 = arith.constant 0 : index
    %c0_11 = arith.constant 0 : index
    %16 = vector.load %arg6[%c0_10, %c0_11] : memref<128x128xbf16, #tpu.memory_space<vmem>>, vector<128x128xbf16>
    %cst_12 = arith.constant dense<0.000000e+00> : vector<8x128xf32>
    %17 = tpu.matmul %15, %16, %cst_12 {dimension_numbers = #tpu.dot_dimension_numbers<[1], [0], [0], [1], [0, 0, 1, 1], [], []>} : vector<8x128xbf16>, vector<128x128xbf16>, vector<8x128xf32> -> vector<8x128xf32>
    %c0_13 = arith.constant 0 : index
    %c0_14 = arith.constant 0 : index
    %18 = vector.load %arg7[%c0_13, %c0_14] : memref<1x128xf32, #tpu.memory_space<vmem>>, vector<1x128xf32>
    %19 = vector.broadcast %18 : vector<1x128xf32> to vector<8x128xf32>
    %20 = arith.addf %17, %19 : vector<8x128xf32>
    %cst_15 = arith.constant 0.00999999977 : f32
    %21 = vector.broadcast %cst_15 : f32 to vector<8x128xf32>
    %22 = arith.mulf %21, %20 : vector<8x128xf32>
    %23 = arith.maximumf %20, %22 : vector<8x128xf32>
    %c0_16 = arith.constant 0 : index
    %c0_17 = arith.constant 0 : index
    %24 = vector.load %arg8[%c0_16, %c0_17] : memref<128x256xf32, #tpu.memory_space<vmem>>, vector<128x256xf32>
    %cst_18 = arith.constant dense<0.000000e+00> : vector<8x256xf32>
    %25 = tpu.matmul %23, %24, %cst_18 {dimension_numbers = #tpu.dot_dimension_numbers<[1], [0], [0], [1], [0, 0, 1, 1], [], []>} : vector<8x128xf32>, vector<128x256xf32>, vector<8x256xf32> -> vector<8x256xf32>
    %c0_19 = arith.constant 0 : index
    %c0_20 = arith.constant 0 : index
    %26 = vector.load %arg9[%c0_19, %c0_20] : memref<1x256xf32, #tpu.memory_space<vmem>>, vector<1x256xf32>
    %27 = vector.broadcast %26 : vector<1x256xf32> to vector<8x256xf32>
    %28 = arith.addf %25, %27 : vector<8x256xf32>
    %29 = vector.extract_strided_slice %28 {offsets = [0, 0], sizes = [8, 8], strides = [1, 1]} : vector<8x256xf32> to vector<8x8xf32>
    %30 = vector.extract_strided_slice %28 {offsets = [0, 128], sizes = [8, 8], strides = [1, 1]} : vector<8x256xf32> to vector<8x8xf32>
    %31 = vector.broadcast %2 : vector<1x8xf32> to vector<8x8xf32>
    %32 = arith.mulf %29, %31 : vector<8x8xf32>
    %33 = vector.broadcast %1 : vector<1x8xf32> to vector<8x8xf32>
    %34 = arith.mulf %33, %30 : vector<8x8xf32>
    %35 = math.exp %32 : vector<8x8xf32>
    %36 = arith.mulf %4, %35 : vector<8x8xf32>
    %37 = arith.addf %5, %36 : vector<8x8xf32>
    %38 = arith.addf %37, %34 : vector<8x8xf32>
    %c0_21 = arith.constant 0 : index
    %c0_22 = arith.constant 0 : index
    %39 = vector.load %arg10[%c0_21, %c0_22] : memref<8x8xf32, #tpu.memory_space<vmem>>, vector<8x8xf32>
    tpu.vector_store %arg10[%c0_21, %c0_22], %38 {strides = array<i32>} : memref<8x8xf32, #tpu.memory_space<vmem>>, vector<8x8xf32>,
    %cst_23 = arith.constant dense<0.000000e+00> : vector<8xf32>
    %40 = vector.multi_reduction <add>, %32, %cst_23 [1] : vector<8x8xf32> to vector<8xf32>
    %41 = vector.shape_cast %40 : vector<8xf32> to vector<8x1xf32>
    %c0_24 = arith.constant 0 : index
    %c0_25 = arith.constant 0 : index
    %42 = vector.load %arg11[%c0_24, %c0_25] : memref<8x1xf32, #tpu.memory_space<vmem>>, vector<8x1xf32>
    tpu.vector_store %arg11[%c0_24, %c0_25], %41 {strides = array<i32>} : memref<8x1xf32, #tpu.memory_space<vmem>>, vector<8x1xf32>,
    return
  }
  func.func @transform_0(%arg0: i32) -> (i32, i32) {
    %c0_i32 = arith.constant 0 : i32
    %c0_i32_0 = arith.constant 0 : i32
    return %arg0, %c0_i32 : i32, i32
  }
  func.func @transform_1(%arg0: i32) -> (i32, i32) {
    %c0_i32 = arith.constant 0 : i32
    %c0_i32_0 = arith.constant 0 : i32
    %c0_i32_1 = arith.constant 0 : i32
    return %c0_i32, %c0_i32_0 : i32, i32
  }
  func.func @transform_2(%arg0: i32) -> (i32, i32) {
    %c0_i32 = arith.constant 0 : i32
    %c0_i32_0 = arith.constant 0 : i32
    %c0_i32_1 = arith.constant 0 : i32
    return %c0_i32, %c0_i32_0 : i32, i32
  }
  func.func @transform_3(%arg0: i32) -> (i32, i32) {
    %c0_i32 = arith.constant 0 : i32
    %c0_i32_0 = arith.constant 0 : i32
    %c0_i32_1 = arith.constant 0 : i32
    return %c0_i32, %c0_i32_0 : i32, i32
  }
  func.func @transform_4(%arg0: i32) -> (i32, i32) {
    %c0_i32 = arith.constant 0 : i32
    %c0_i32_0 = arith.constant 0 : i32
    %c0_i32_1 = arith.constant 0 : i32
    return %c0_i32, %c0_i32_0 : i32, i32
  }
  func.func @transform_5(%arg0: i32) -> (i32, i32) {
    %c0_i32 = arith.constant 0 : i32
    %c0_i32_0 = arith.constant 0 : i32
    %c0_i32_1 = arith.constant 0 : i32
    return %c0_i32, %c0_i32_0 : i32, i32
  }
  func.func @transform_6(%arg0: i32) -> (i32, i32) {
    %c0_i32 = arith.constant 0 : i32
    %c0_i32_0 = arith.constant 0 : i32
    %c0_i32_1 = arith.constant 0 : i32
    return %c0_i32, %c0_i32_0 : i32, i32
  }
  func.func @transform_7(%arg0: i32) -> (i32, i32) {
    %c0_i32 = arith.constant 0 : i32
    %c0_i32_0 = arith.constant 0 : i32
    %c0_i32_1 = arith.constant 0 : i32
    return %c0_i32, %c0_i32_0 : i32, i32
  }
  func.func @transform_8(%arg0: i32) -> (i32, i32) {
    %c0_i32 = arith.constant 0 : i32
    %c0_i32_0 = arith.constant 0 : i32
    %c0_i32_1 = arith.constant 0 : i32
    return %c0_i32, %c0_i32_0 : i32, i32
  }
  func.func @transform_9(%arg0: i32) -> (i32, i32) {
    %c0_i32 = arith.constant 0 : i32
    %c0_i32_0 = arith.constant 0 : i32
    return %arg0, %c0_i32 : i32, i32
  }
  func.func @transform_10(%arg0: i32) -> (i32, i32) {
    %c0_i32 = arith.constant 0 : i32
    %c0_i32_0 = arith.constant 0 : i32
    return %arg0, %c0_i32 : i32, i32
  }
}

</mosaic_0001>

<bundles_post_ra>
// kernel: tpu_custom_call.1
= control target key start
LH: loop header
LB: loop body
LE: loop exit
PB: predicated region body
PF: predicated region fallthrough
CT: control target
= control target key end

     0   :  { %16 = vsyncpa [#allocation3], 0  ;;  %s807_s0 = inlined_call_operand.hbm [shape: f32[8,8], index: 0, kind: input, shape index: {}]   ;;  %s808_s1 = inlined_call_operand.vmem [shape: f32[1,8], index: 1, kind: input, shape index: {}]   ;;  %s809_s2 = inlined_call_operand.hbm [shape: f32[1,8], index: 2, kind: input, shape index: {}]   ;;  %s810_s3 = inlined_call_operand.vmem [shape: bf16[8,128], index: 3, kind: input, shape index: {}]   ;;  %s811_s4 = inlined_call_operand.vmem [shape: f32[1,128], index: 4, kind: input, shape index: {}]   ;;  %s812_s5 = inlined_call_operand.hbm [shape: bf16[128,128], index: 5, kind: input, shape index: {}]   ;;  %s813_s6 = inlined_call_operand.vmem [shape: f32[1,128], index: 6, kind: input, shape index: {}]   ;;  %s814_s7 = inlined_call_operand.hbm [shape: f32[128,256], index: 7, kind: input, shape index: {}]   ;;  %s815_s8 = inlined_call_operand.vmem [shape: f32[1,256], index: 8, kind: input, shape index: {}]   ;;  %s816_s9 = inlined_call_operand.hbm [shape: f32[8,8], index: 9, kind: output, shape index: {0}]   ;;  %s817_s10 = inlined_call_operand.vmem [shape: f32[8,1], index: 10, kind: output, shape index: {1}]  }
   0x1   :  { %17 = vsyncpa [#allocation6], 0 }
   0x2   :  { %18 = vsyncpa [#allocation9], 0 }
   0x3   :  { %19 = vsyncpa [#allocation4], 0  ;;  %s647_s13 = smov [#allocation5]   ;;  %s648_s15 = smov [#allocation2]  }
   0x4   :  { %s38_s14 = sshll.u32 %s647_s13, 4  ;;  %s26_s16 = sshll.u32 %s648_s15, 4  ;;  %s39_s14 = int_to_ptr.vmem [resolvable:$true] %s38_s14  ;;  %s27_s16 = int_to_ptr.vmem [resolvable:$true] %s26_s16 }
   0x5   :  { %s529_s19 = scalar_lea.hbm %s809_s2, 16 }
   0x6   :  { %p530_p0 = scmp.ne.s32.totalorder %s809_s2, %s529_s19  ;;  %p533_p1 = scmp.lt.u32.totalorder %s529_s19, %s809_s2 }
   0x8   :  { %p535_p2 = pnand %p533_p1, %p530_p0 }
   0xa   :  { %538 = shalt.err (!%p535_p2)
}
   0xb   :  { %s539_s24 = scalar_lea.vmem %s39_s14, 16  ;;  %s543_s25 = scalar_lea.vmem %s39_s14, 32 }
   0xc   :  { %p540_p3 = scmp.ne.s32.totalorder %s39_s14, %s539_s24  ;;  %p544_p4 = scmp.lt.s32.totalorder %s39_s14, %s39_s14 }
   0xd   :  { %p545_p5 = scmp.lt.s32.totalorder %s543_s25, %s539_s24 }
   0xf   :  { %p546_p6 = por %p545_p5, %p544_p4 }
  0x11   :  { %p547_p7 = pnand %p546_p6, %p540_p3 }
  0x13   :  { %550 = shalt.err (!%p547_p7)
}
  0x14   :  { %41 = dma.hbm_to_vmem [thread:$0]  %s809_s2, 16, %s39_s14, [#allocation6]  }
  0x15   :  { %s551_s30 = scalar_lea.hbm %s807_s0, 128 }
  0x16   :  { %p552_p8 = scmp.ne.s32.totalorder %s807_s0, %s551_s30  ;;  %p555_p9 = scmp.lt.u32.totalorder %s551_s30, %s807_s0 }
  0x18   :  { %p557_p10 = pnand %p555_p9, %p552_p8 }
  0x1a   :  { %560 = shalt.err (!%p557_p10)
}
  0x1b   :  { %s561_s17 = scalar_lea.vmem %s27_s16, 128  ;;  %p566_p12 = scmp.lt.s32.totalorder %s27_s16, %s27_s16 }
  0x1c   :  { %p562_p11 = scmp.ne.s32.totalorder %s27_s16, %s561_s17  ;;  %p567_p13 = scmp.lt.s32.totalorder %s561_s17, %s561_s17 }
  0x1e   :  { %p568_p0 = por %p567_p13, %p566_p12 }
  0x20   :  { %p569_p1 = pnand %p568_p0, %p562_p11 }
  0x22   :  { %572 = shalt.err (!%p569_p1)
}
  0x23   :  { %29 = dma.hbm_to_vmem [thread:$0]  %s807_s0, 128, %s27_s16, [#allocation3]  }
  0x24   :  { %s649_s18 = smov [#allocation7]   ;;  %s573_s22 = scalar_lea.hbm %s812_s5, 1024 }
  0x25   :  { %s51_s19 = sshll.u32 %s649_s18, 4  ;;  %p574_p2 = scmp.ne.s32.totalorder %s812_s5, %s573_s22  ;;  %s52_s19 = int_to_ptr.vmem [resolvable:$true] %s51_s19 }
  0x26   :  { %p577_p3 = scmp.lt.u32.totalorder %s573_s22, %s812_s5 }
  0x28   :  { %p579_p4 = pnand %p577_p3, %p574_p2 }
  0x2a   :  { %582 = shalt.err (!%p579_p4)
}
  0x2b   :  { %s583_s27 = scalar_lea.vmem %s52_s19, 1024  ;;  %p588_p6 = scmp.lt.s32.totalorder %s52_s19, %s52_s19 }
  0x2c   :  { %p584_p5 = scmp.ne.s32.totalorder %s52_s19, %s583_s27  ;;  %p589_p7 = scmp.lt.s32.totalorder %s583_s27, %s583_s27 }
  0x2e   :  { %p590_p8 = por %p589_p7, %p588_p6 }
  0x30   :  { %p591_p9 = pnand %p590_p8, %p584_p5 }
  0x32   :  { %594 = shalt.err (!%p591_p9)
}
  0x33   :  { %s650_s0 = smov 64   ;;  %s651_s16 = smov 4  }
  0x34   :  { %57 = dma.hbm_to_vmem [thread:$0]  %s812_s5, 1024, %s52_s19, [#allocation6], %s650_s0, %s650_s0, %s651_s16  }
  0x35   :  { %s652_s30 = smov [#allocation8]   ;;  %s595_s15 = scalar_lea.hbm %s814_s7, 4096 }
  0x36   :  { %s65_s11 = sshll.u32 %s652_s30, 4  ;;  %p596_p10 = scmp.ne.s32.totalorder %s814_s7, %s595_s15  ;;  %s66_s11 = int_to_ptr.vmem [resolvable:$true] %s65_s11 }
  0x37   :  { %p599_p11 = scmp.lt.u32.totalorder %s595_s15, %s814_s7 }
  0x39   :  { %p601_p12 = pnand %p599_p11, %p596_p10 }
  0x3b   :  { %604 = shalt.err (!%p601_p12)
}
  0x3c   :  { %s605_s20 = scalar_lea.vmem %s66_s11, 4096  ;;  %p610_p0 = scmp.lt.s32.totalorder %s66_s11, %s66_s11 }
  0x3d   :  { %p606_p13 = scmp.ne.s32.totalorder %s66_s11, %s605_s20  ;;  %p611_p1 = scmp.lt.s32.totalorder %s605_s20, %s605_s20 }
  0x3f   :  { %p612_p2 = por %p611_p1, %p610_p0 }
  0x41   :  { %p613_p3 = pnand %p612_p2, %p606_p13 }
  0x43   :  { %616 = shalt.err (!%p613_p3)
}
  0x44   :  { %s653_s5 = smov 256   ;;  %s654_s19 = smov 16  }
  0x45   :  { %71 = dma.hbm_to_vmem [thread:$0]  %s814_s7, 4096, %s66_s11, [#allocation9], %s653_s5, %s653_s5, %s654_s19  }
  0x46   :  { %639 = dma.done.wait [#allocation3], 128  }
  0x47   :  { %640 = vsyncadd [#allocation3], 4294967168 }
  0x48   :  { %641 = dma.done.wait [#allocation6], 1040  }
  0x49   :  { %642 = vsyncadd [#allocation6], 4294966256 }
  0x4a   :  { %643 = dma.done.wait [#allocation9], 4096  }
  0x4b   :  { %644 = vsyncadd [#allocation9], 4294963200  ;;  %v655_v0 = vmov 0.0   ;;  %vm656_vm0 = vmmov 0   ;;  %vm111_vm1 = vcmask 1043456   ;;  %v87_v2 = vld [vmem:[#allocation2] sm:$0xff] }
  0x4c   :  { %450 = vmatprep.subr.bf16.mxu0 %v655_v0  ;;  %452 = vmatprep.mubr.msk.bf16.mxu0 %vm656_vm0, %v655_v0  ;;  %v99_v1 = vld [vmem:[%s810_s3] sm:$0xf]  ;;  %v519_v6 = vld [vmem:[#allocation7] sm:$0xff]   ;;  %v520_v8 = vld [vmem:[#allocation7 + $0x8] sm:$0xff]   ;;  %vm107_vm2 = vcmask 64512  }
  0x4d   :  { %456 = vmatprep.subr.bf16.mxu1 %v655_v0  ;;  %472 = vmatprep.mubr.msk.bf16.mxu1 %vm656_vm0, %v655_v0  ;;  %v767_v3 = vld [vmem:[%s808_s1] ss:$0 sm:$0xff]  ;;  %v113_v4 = vsel %vm111_vm1, %v99_v1, 0  ;;  %v522_v11 = vld [vmem:[#allocation7 + $0x18] sm:$0xff]   ;;  %v523_v12 = vld [vmem:[#allocation7 + $0x20] sm:$0xff]  }
  0x4e   :  { %v770_v5 = vmul.f32 %v767_v3, %v87_v2  ;;  %451 = vmatpush3.bf16.msra.mxu0 %v113_v4  ;;  %457 = vmatpush3.bf16.msra.mxu1 %v519_v6  ;;  %v521_v10 = vld [vmem:[#allocation7 + $0x10] sm:$0xff]   ;;  %v524_v13 = vld [vmem:[#allocation7 + $0x28] sm:$0xff]   ;;  %v526_v15 = vld [vmem:[#allocation7 + $0x38] sm:$0xff]  }
  0x4f   :  { %458 = vmatprep.subr.bf16.mxu1 %v655_v0  ;;  %v525_v14 = vld [vmem:[#allocation7 + $0x30] sm:$0xff]   ;;  %v272_v16 = vld [vmem:[#allocation8 + $0x8] sm:$0xff]  ;;  %v274_v17 = vld [vmem:[#allocation8 + $0x18] sm:$0xff] }
  0x50   :  { %v773_v7 = vsub.f32 %v87_v2, %v770_v5  ;;  %v271_v18 = vld [vmem:[#allocation8] sm:$0xff]  ;;  %v476_v19 = vpack.c.bf16 %v274_v17, %v272_v16  ;;  %v273_v20 = vld [vmem:[#allocation8 + $0x10] sm:$0xff]  ;;  %v276_v21 = vld [vmem:[#allocation8 + $0x28] sm:$0xff] }
  0x51   :  { %v278_v22 = vld [vmem:[#allocation8 + $0x38] sm:$0xff]  ;;  %v478_v23 = vpack.c.bf16 %v273_v20, %v271_v18  ;;  %v275_v25 = vld [vmem:[#allocation8 + $0x20] sm:$0xff]  ;;  %v277_v26 = vld [vmem:[#allocation8 + $0x30] sm:$0xff]  ;;  %v305_v20 = vlaneseq }
  0x52   :  { %v98_v9 = vpack.c.bf16 %v773_v7, %v773_v7  ;;  %459 = vmatpush3.bf16.msra.mxu1 %v520_v8  ;;  %v480_v24 = vpack.c.bf16 %v278_v22, %v276_v21  ;;  %v280_v27 = vld [vmem:[#allocation8 + $0x48] sm:$0xff]  ;;  %477 = vmatprep.subr.bf16.mxu0 %v476_v19  ;;  %v282_v28 = vld [vmem:[#allocation8 + $0x58] sm:$0xff]  ;;  %v482_v29 = vpack.c.bf16 %v277_v26, %v275_v25  ;;  %v279_v31 = vld [vmem:[#allocation8 + $0x40] sm:$0xff] }
  0x53   :  { %460 = vmatprep.subr.bf16.mxu1 %v655_v0  ;;  %v484_v30 = vpack.c.bf16 %v282_v28, %v280_v27  ;;  %v281_v32 = vld [vmem:[#allocation8 + $0x50] sm:$0xff]  ;;  %v284_v33 = vld [vmem:[#allocation8 + $0x68] sm:$0xff]  ;;  %v286_v34 = vld [vmem:[#allocation8 + $0x78] sm:$0xff]  ;;  %v306_v21 = vshrl.u32 %v305_v20, 7 }
  0x54   :  { %453 = vmatmul.mubr.msk.bf16.vlgmr.msra.gmra.mrb[0].mxu0 %vm107_vm2, %v98_v9  ;;  %v486_v35 = vpack.c.bf16 %v281_v32, %v279_v31  ;;  %v488_v36 = vpack.c.bf16 %v286_v34, %v284_v33  ;;  %v283_v37 = vld [vmem:[#allocation8 + $0x60] sm:$0xff]  ;;  %v285_v38 = vld [vmem:[#allocation8 + $0x70] sm:$0xff]  ;;  %v288_v39 = vld [vmem:[#allocation8 + $0x88] sm:$0xff] }
  0x55   :  { %379 = vmatprep.mubr.f32.mxu0 %v655_v0  ;;  %479 = vmatpush1.bf16.msra.mxu0 %v478_v23  ;;  %v290_v40 = vld [vmem:[#allocation8 + $0x98] sm:$0xff]  ;;  %v490_v41 = vpack.c.bf16 %v285_v38, %v283_v37  ;;  %v287_v43 = vld [vmem:[#allocation8 + $0x80] sm:$0xff]  ;;  %v289_v44 = vld [vmem:[#allocation8 + $0x90] sm:$0xff]  ;;  %v307_v22 = vsub.s32 0, %v306_v21  ;;  %v311_v32 = vsub.s32 1, %v306_v21 }
  0x56   :  { %461 = vmatpush3.bf16.msra.mxu1 %v521_v10  ;;  %481 = vmatprep.subr.bf16.mxu0 %v480_v24  ;;  %v492_v42 = vpack.c.bf16 %v290_v40, %v288_v39  ;;  %v292_v45 = vld [vmem:[#allocation8 + $0xa8] sm:$0xff]  ;;  %v294_v46 = vld [vmem:[#allocation8 + $0xb8] sm:$0xff]  ;;  %v494_v47 = vpack.c.bf16 %v289_v44, %v287_v43  ;;  %v291_v49 = vld [vmem:[#allocation8 + $0xa0] sm:$0xff] }
  0x57   :  { %462 = vmatprep.subr.bf16.mxu1 %v655_v0  ;;  %v496_v48 = vpack.c.bf16 %v294_v46, %v292_v45  ;;  %v293_v50 = vld [vmem:[#allocation8 + $0xb0] sm:$0xff]  ;;  %v296_v51 = vld [vmem:[#allocation8 + $0xc8] sm:$0xff]  ;;  %v298_v52 = vld [vmem:[#allocation8 + $0xd8] sm:$0xff] }
  0x58   :  { %v498_v53 = vpack.c.bf16 %v293_v50, %v291_v49  ;;  %v500_v54 = vpack.c.bf16 %v298_v52, %v296_v51  ;;  %v427_v55 = vld [vmem:[%s811_s4] ss:$0 sm:$0xff]  ;;  %v300_v4 = vld [vmem:[#allocation8 + $0xe8] sm:$0xff]  ;;  %v302_v6 = vld [vmem:[#allocation8 + $0xf8] sm:$0xff] }
  0x59   :  { %483 = vmatpush1.bf16.msra.mxu0 %v482_v29  ;;  %v297_v1 = vld [vmem:[#allocation8 + $0xd0] sm:$0xff]  ;;  %v504_v8 = vpack.c.bf16 %v302_v6, %v300_v4  ;;  %v299_v9 = vld [vmem:[#allocation8 + $0xe0] sm:$0xff]  ;;  %v438_v26 = vld [vmem:[#allocation5] ss:$0 sm:$0xff] }
  0x5a   :  { %463 = vmatpush3.bf16.msra.mxu1 %v522_v11  ;;  %485 = vmatprep.subr.bf16.mxu0 %v484_v30  ;;  %v301_v10 = vld [vmem:[#allocation8 + $0xf0] sm:$0xff] }
  0x5b   :  { %464 = vmatprep.subr.bf16.mxu1 %v655_v0  ;;  %v506_v11 = vpack.c.bf16 %v301_v10, %v299_v9  ;;  %v303_v23 = vld [vmem:[%s815_s8] sm:$0x3] }
  0x5c   :  { %v308_v24 = vrot.slane %v303_v23, %v307_v22  ;;  %v312_v33 = vrot.slane %v303_v23, %v311_v32 }
  0x5d   :  { %487 = vmatpush1.bf16.msra.mxu0 %v486_v35 }
  0x5e   :  { %465 = vmatpush3.bf16.msra.mxu1 %v523_v12  ;;  %489 = vmatprep.subr.bf16.mxu0 %v488_v36  ;;  %v429_v12 = vld [vmem:[%s813_s6] ss:$0 sm:$0xff]  ;;  %s657_s6 = smov [#allocation10]  }
  0x5f   :  { %466 = vmatprep.subr.bf16.mxu1 %v655_v0  ;;  %s411_s16 = sshll.u32 %s657_s6, 4  ;;  %s412_s16 = int_to_ptr.vmem [resolvable:$true] %s411_s16 }
  0x60   :  { %s617_s8 = scalar_lea.vmem %s412_s16, 128  ;;  %p622_p5 = scmp.lt.s32.totalorder %s412_s16, %s412_s16 }
  0x61   :  { %491 = vmatpush1.bf16.msra.mxu0 %v490_v41  ;;  %p618_p4 = scmp.ne.s32.totalorder %s412_s16, %s617_s8  ;;  %p623_p6 = scmp.lt.s32.totalorder %s617_s8, %s617_s8 }
  0x62   :  { %467 = vmatpush3.bf16.msra.mxu1 %v524_v13  ;;  %493 = vmatprep.subr.bf16.mxu0 %v492_v42 }
  0x63   :  { %468 = vmatprep.subr.bf16.mxu1 %v655_v0  ;;  %p624_p7 = por %p623_p6, %p622_p5 }
  0x65   :  { %495 = vmatpush1.bf16.msra.mxu0 %v494_v47  ;;  %p625_p8 = pnand %p624_p7, %p618_p4 }
  0x66   :  { %469 = vmatpush3.bf16.msra.mxu1 %v525_v14  ;;  %497 = vmatprep.subr.bf16.mxu0 %v496_v48 }
  0x67   :  { %470 = vmatprep.subr.bf16.mxu1 %v655_v0  ;;  %v295_v0 = vld [vmem:[#allocation8 + $0xc0] sm:$0xff] }
  0x68   :  { %v502_v2 = vpack.c.bf16 %v297_v1, %v295_v0 }
  0x69   :  { %499 = vmatpush1.bf16.msra.mxu0 %v498_v53 }
  0x6a   :  { %471 = vmatpush3.bf16.msra.mxu1 %v526_v15  ;;  %501 = vmatprep.subr.bf16.mxu0 %v500_v54 }
  0x6d   :  { %503 = vmatpush1.bf16.msra.mxu0 %v502_v2 }
  0x6e   :  { %505 = vmatprep.subr.bf16.mxu0 %v504_v8 }
  0x71   :  { %507 = vmatpush1.bf16.msra.mxu0 %v506_v11 }
 0x127   :  { %v149_v56 = vpop.f32.mrb[0].mxu0 }
 0x128   :  { %v150_v57 = vadd.f32 %v427_v55, %v149_v56  ;;  %v454_v58 = vpop.f32.mrb[1].mxu0 }
 0x129   :  { %v152_v59 = vpop.f32.mrb[2].mxu0 }
 0x12a   :  { %v155_v60 = vmul.f32 0.01, %v150_v57  ;;  %v455_v61 = vpop.f32.mrb[3].mxu0 }
 0x12c   :  { %v156_v62 = vmax.f32 %v150_v57, %v155_v60 }
 0x12e   :  { %v157_v63 = vpack.c.bf16 %v156_v62, %v156_v62 }
 0x130   :  { %473 = vmatmul.mubr.bf16.vlgmr.msra.gmra.mrb[0].mxu1 %v157_v63 }
 0x203   :  { %v263_v13 = vpop.f32.mrb[0].mxu1 }
 0x204   :  { %v264_v14 = vadd.f32 %v429_v12, %v263_v13  ;;  %v474_v15 = vpop.f32.mrb[1].mxu1 }
 0x205   :  { %v266_v16 = vpop.f32.mrb[2].mxu1 }
 0x206   :  { %v269_v17 = vmul.f32 0.01, %v264_v14  ;;  %v475_v18 = vpop.f32.mrb[3].mxu1 }
 0x208   :  { %v270_v19 = vmax.f32 %v264_v14, %v269_v17 }
 0x20a   :  { %380 = vmatmul.mubr.f32.vlgmr.msra.gmra.mrb[4].mxu0 %v270_v19 }
 0x2dd   :  { %v381_v25 = vpop.f32.mrb[4].mxu0 }
 0x2de   :  { %v382_v27 = vadd.f32 %v381_v25, %v308_v24  ;;  %v383_v28 = vpop.f32.mrb[5].mxu0 }
 0x2df   :  { %v384_v34 = vadd.f32 %v383_v28, %v312_v33 }
 0x2e0   :  { %v392_v29 = vmul.f32 %v438_v26, %v382_v27 }
 0x2e1   :  { %v393_v37 = vmul.f32 %v767_v3, %v384_v34 }
 0x2e2   :  { %v394_v30 = vmul.f32 1.442695, %v392_v29  ;;  %v400_v31 = vsel %vm107_vm2, %v392_v29, 0.0 }
 0x2e3   :  { %401 = vadd.xlane.f32.xlu0 %v400_v31 }
 0x2e4   :  { %527 = vpow2.f32 %v394_v30 }
 0x2ee   :  { %v528_v35 = vpop.eup %527 }
 0x2ef   :  { %v396_v36 = vmul.f32 %v528_v35, %v770_v5 }
 0x2f1   :  { %v397_v38 = vadd.f32 %v396_v36, %v773_v7 }
 0x2f3   :  { %v398_v39 = vadd.f32 %v397_v38, %v393_v37 }
 0x2f5   :  { %399 = vst.msk [vmem:[#allocation10] sm:$0xff] %vm107_vm2, %v398_v39 }
 0x2f6   :  { %628 = shalt.err (!%p625_p8)
}
 0x2f7   :  { %s629_s30 = scalar_lea.hbm %s816_s9, 128 }
 0x2f8   :  { %p630_p9 = scmp.ne.s32.totalorder %s816_s9, %s629_s30  ;;  %p633_p10 = scmp.lt.u32.totalorder %s629_s30, %s816_s9 }
 0x2fa   :  { %p635_p11 = pnand %p633_p10, %p630_p9 }
 0x2fc   :  { %638 = shalt.err (!%p635_p11)
}
 0x2fd   :  { %414 = dma.vmem_to_hbm [thread:$0]  %s412_s16, 128, %s816_s9, [#allocation4]   ;;  %vm403_vm3 = vcmask 7168  }
 0x370   :  { %v402_v3 = vpop.xlane.xlu0 %401 }
 0x371   :  { %404 = vst.msk [vmem:[%s817_s10] sm:$0xff] %vm403_vm3, %v402_v3 }
 0x372   :  { %645 = dma.done.wait [#allocation4], 128  }
 0x373   :  { %646 = vsyncadd [#allocation4], 4294967168 }
 0x374   :  { %422 = vsyncpa [#allocation3], 1 }
 0x375   :  { %423 = vsyncpa [#allocation6], 1 }
 0x376   :  { %424 = vsyncpa [#allocation9], 1 }
 0x377   :  { %425 = vsyncpa [#allocation4], 1 }

</bundles_post_ra>
